<compile_context>
chip_gen: v6e
topology: v6e:2x2x1
jax: 0.10.0
libtpu: 0.0.40
codegen_flags: <defaults>
</compile_context>

<pallas_src>
import functools

import jax
import jax.numpy as jnp
from jax.experimental import pallas as pl
from jax.experimental.pallas import tpu as pltpu

KERNEL_SIZE = 7
PAD = 3                        # Conv1d padding for kernel_size=7 (as in PyTorch)
LANE = 128                     # TPU lane width
ACC_LANE_BUDGET = 4096         # cap TB*T_pad so each (TB, T) f32 accumulator is ~4 vregs
CHUNK_VREG_BYTES = 128 << 10   # cap the f32 working copy of one E chunk (~32 vregs)
MAX_UNROLLED_CHUNKS = 8        # beyond this, use fori_loop to bound live ranges


# ----------------------------------------------------------------------------
# Hardware-aware sizing helpers
# ----------------------------------------------------------------------------
def _device_kind() -> str:
    try:
        return jax.devices()[0].device_kind.lower()
    except Exception:
        return ""


def _vmem_budgets():
    """Per-generation (block_budget_bytes, vmem_limit_bytes).

    v4/v5e/v6e have 128 MiB of VMEM, v7x only 64 MiB; size the double-buffered
    blocks from the actual capacity instead of one conservative constant.
    """
    cap = None
    try:
        cap = int(pltpu.get_tpu_info().vmem_capacity_bytes)
    except Exception:
        cap = None
    if not cap:
        kind = _device_kind()
        if any(v in kind for v in ("v4", "v5", "v6")):
            cap = 128 << 20
        else:                              # v7x (64 MiB) / unknown: conservative
            cap = 64 << 20
    vmem_limit = (cap * 3) // 4            # leave headroom for Mosaic internals
    block_budget = vmem_limit // 6         # in+out, double-buffered (4 blocks) + slack
    return block_budget, vmem_limit


def _pass2_dtype(dtype):
    """Compute dtype for the broadcast-multiply pass.

    bf16 is multiplied natively on chips with a bf16-capable VPU (v6e / v7x);
    v5e (no bf16 VALU) and unknown chips use the f32 path.
    """
    if jnp.dtype(dtype) == jnp.dtype(jnp.bfloat16):
        kind = _device_kind()
        if ("v6" in kind) or ("v7" in kind):
            return jnp.bfloat16
    return jnp.float32


def _sublane_multiple(dtype) -> int:
    """Sublane packing multiple: 8 for f32, 16 for bf16, 32 for int8/fp8."""
    itemsize = jnp.dtype(dtype).itemsize
    return 8 * max(1, 4 // max(1, itemsize))


def _largest_aligned_divisor(e: int, sub: int, max_ec: int) -> int:
    """Largest multiple of `sub` that divides `e` and is <= max_ec.

    Falls back to `e` itself (single chunk) when E is not a multiple of the
    packing factor; correct but a spill hazard for very large odd E (do NOT
    zero-pad E instead: zero rows would corrupt the max-over-E channel).
    """
    start = min(e, max(sub, max_ec))
    start -= start % sub
    ec = start
    while ec >= sub:
        if e % ec == 0:
            return ec
        ec -= sub
    return e


def _pick_batch_tile(b, e, t_pad, itemsize, block_budget):
    """Largest divisor of B whose (TB, E, T_pad) block fits the budgets,
    capped so the grid keeps >= 2 steps (v7x has 2 TensorCores to feed, and a
    single giant step would leave the in/out DMAs completely unoverlapped)."""
    per_b = max(1, e * t_pad * itemsize)
    max_tb = max(1, block_budget // per_b)
    max_tb = min(max_tb, max(1, ACC_LANE_BUDGET // t_pad))
    if b >= 2:
        max_tb = min(max_tb, b // 2)
    tb = 1
    for cand in range(2, b + 1):
        if b % cand == 0 and cand <= max_tb:
            tb = cand
    return tb


# ----------------------------------------------------------------------------
# Shared conv + sigmoid helper
# ----------------------------------------------------------------------------
def _conv_sigmoid(w_ref, avg, mx, use_mask):
    """Conv1d(2->1, k=7, pad=3, bias=False) + sigmoid on (TB, T) f32 maps.

    Implemented as 7 unrolled shift-MAC taps.  pltpu.roll lowers to an XLU
    lane-rotate in the otherwise-idle vector-extended slot.  When the wrapper
    guarantees >= PAD zero lanes of right padding, wrap-around rotations only
    ever pull zeros (left edge) or land in the sliced-off pad region (right
    edge), so the per-tap validity mask is skipped entirely (use_mask=False).
    """
    tb, t = avg.shape
    # Hoist the 14 scalar weight reads once (cheap SMEM scalar loads).
    w_avg = [w_ref[k] for k in range(KERNEL_SIZE)]
    w_max = [w_ref[KERNEL_SIZE + k] for k in range(KERNEL_SIZE)]
    lane = jax.lax.broadcasted_iota(jnp.int32, (tb, t), 1) if use_mask else None

    y = jnp.zeros((tb, t), jnp.float32)
    for k in range(KERNEL_SIZE):
        d = k - PAD                      # tap offset: out[i] += w[k] * in[i + d]
        shift = (-d) % t                 # jnp.roll(x, -d) == roll by (-d) mod t
        a_sh = pltpu.roll(avg, shift, 1) if shift else avg
        m_sh = pltpu.roll(mx, shift, 1) if shift else mx
        if use_mask:
            valid = (lane + d >= 0) & (lane + d < t)
            a_sh = jnp.where(valid, a_sh, 0.0)
            m_sh = jnp.where(valid, m_sh, 0.0)
        y = y + w_avg[k] * a_sh + w_max[k] * m_sh
    return jax.nn.sigmoid(y)


# ----------------------------------------------------------------------------
# Primary single-kernel path: one (TB, E, T_pad) slab per grid step
# ----------------------------------------------------------------------------
def _spatial_attention_kernel(w_ref, x_ref, o_ref, *, e_chunk, use_mask,
                              pass2_dtype):
    """w_ref: (2*K,) f32 in SMEM = [avg taps | max taps].
    x_ref / o_ref: (TB, E, T_pad) blocks in VMEM (T lane-dense)."""
    tb, e, t = x_ref.shape
    ec = e_chunk
    n_chunks = e // ec

    # ---- Pass 1: stream E in sublane-aligned chunks; only (TB, T) f32
    # accumulators stay live.  fori_loop bounds live ranges for long loops.
    s0 = jnp.zeros((tb, t), jnp.float32)
    m0 = jnp.full((tb, t), -jnp.inf, jnp.float32)
    if n_chunks <= MAX_UNROLLED_CHUNKS:
        s, mx = s0, m0
        for ci in range(n_chunks):
            xc = x_ref[:, ci * ec:(ci + 1) * ec, :].astype(jnp.float32)
            s = s + jnp.sum(xc, axis=1)
            mx = jnp.maximum(mx, jnp.max(xc, axis=1))
    else:
        def pass1(ci, carry):
            s, mx = carry
            off = pl.multiple_of(ci * ec, 8)
            xc = x_ref[:, pl.ds(off, ec), :].astype(jnp.float32)
            return (s + jnp.sum(xc, axis=1),
                    jnp.maximum(mx, jnp.max(xc, axis=1)))
        s, mx = jax.lax.fori_loop(0, n_chunks, pass1, (s0, m0))

    att = _conv_sigmoid(w_ref, s * (1.0 / e), mx, use_mask)      # (TB, T) f32

    # ---- Pass 2: re-read x chunks from VMEM, broadcast-multiply, store.
    # Cast + broadcast hoisted out of the loop (JAX does not CSE
    # broadcast_in_dim, so leaving it inside re-emits it per chunk).
    att_b = jnp.broadcast_to(att.astype(pass2_dtype)[:, None, :], (tb, ec, t))
    if n_chunks <= MAX_UNROLLED_CHUNKS:
        for ci in range(n_chunks):
            sl = slice(ci * ec, (ci + 1) * ec)
            xc = x_ref[:, sl, :].astype(pass2_dtype)
            o_ref[:, sl, :] = (xc * att_b).astype(o_ref.dtype)
    else:
        def pass2(ci, carry):
            off = pl.multiple_of(ci * ec, 8)
            xc = x_ref[:, pl.ds(off, ec), :].astype(pass2_dtype)
            o_ref[:, pl.ds(off, ec), :] = (xc * att_b).astype(o_ref.dtype)
            return carry
        jax.lax.fori_loop(0, n_chunks, pass2, 0)


# ----------------------------------------------------------------------------
# Fallback two-kernel path for slabs too large for a single VMEM block:
# E is tiled by the grid (resident accumulators), at the cost of one extra
# HBM read of x in the apply kernel.
# ----------------------------------------------------------------------------
def _attention_map_kernel(w_ref, x_ref, att_ref, s_acc, m_acc, *, e_total,
                          use_mask):
    e_idx = pl.program_id(1)

    @pl.when(e_idx == 0)
    def _init():
        s_acc[...] = jnp.zeros_like(s_acc)
        m_acc[...] = jnp.full_like(m_acc, -jnp.inf)

    xc = x_ref[...].astype(jnp.float32)                    # (1, Ec, T_pad)
    s_acc[...] = s_acc[...] + jnp.sum(xc, axis=1)
    m_acc[...] = jnp.maximum(m_acc[...], jnp.max(xc, axis=1))

    @pl.when(e_idx == pl.num_programs(1) - 1)
    def _finalize():
        att = _conv_sigmoid(w_ref, s_acc[...] * (1.0 / e_total), m_acc[...],
                            use_mask)
        att_ref[...] = att[:, None, :]                     # (1, 1, T_pad)


def _apply_attention_kernel(att_ref, x_ref, o_ref, *, pass2_dtype):
    att = att_ref[...].astype(pass2_dtype)                 # (1, 1, T_pad)
    o_ref[...] = (x_ref[...].astype(pass2_dtype) * att).astype(o_ref.dtype)


def _spatial_attention_fallback(w_flat, x_p, *, use_mask, pass2_dtype,
                                block_budget, vmem_limit):
    B, E, T_pad = x_p.shape
    itemsize = jnp.dtype(x_p.dtype).itemsize
    sub = _sublane_multiple(x_p.dtype)
    ec = _largest_aligned_divisor(
        E, sub, max(sub, block_budget // max(1, T_pad * itemsize)))
    n_e = E // ec
    # TODO(synk): if even a (1, sub, T_pad) block exceeds VMEM (extremely long
    # T), a T-tiled variant with a +/-PAD halo DMA would be needed.

    att = pl.pallas_call(
        functools.partial(_attention_map_kernel, e_total=E, use_mask=use_mask),
        out_shape=jax.ShapeDtypeStruct((B, 1, T_pad), jnp.float32),
        grid_spec=pltpu.PrefetchScalarGridSpec(
            num_scalar_prefetch=0,
            grid=(B, n_e),
            in_specs=[
                pl.BlockSpec(memory_space=pltpu.MemorySpace.SMEM),      # weights
                pl.BlockSpec((1, ec, T_pad), lambda b, e: (b, e, 0)),   # x chunk
            ],
            out_specs=pl.BlockSpec((1, 1, T_pad), lambda b, e: (b, 0, 0)),
            scratch_shapes=[pltpu.VMEM((1, T_pad), jnp.float32),
                            pltpu.VMEM((1, T_pad), jnp.float32)],
        ),
        compiler_params=pltpu.CompilerParams(
            dimension_semantics=("parallel", "arbitrary"),
            vmem_limit_bytes=vmem_limit),
    )(w_flat, x_p)

    out = pl.pallas_call(
        functools.partial(_apply_attention_kernel, pass2_dtype=pass2_dtype),
        out_shape=jax.ShapeDtypeStruct((B, E, T_pad), x_p.dtype),
        grid_spec=pltpu.PrefetchScalarGridSpec(
            num_scalar_prefetch=0,
            grid=(B, n_e),
            in_specs=[
                pl.BlockSpec((1, 1, T_pad), lambda b, e: (b, 0, 0)),    # att
                pl.BlockSpec((1, ec, T_pad), lambda b, e: (b, e, 0)),   # x chunk
            ],
            out_specs=pl.BlockSpec((1, ec, T_pad), lambda b, e: (b, e, 0)),
        ),
        compiler_params=pltpu.CompilerParams(
            dimension_semantics=("parallel", "parallel"),
            vmem_limit_bytes=vmem_limit),
    )(att, x_p)
    return out


# ----------------------------------------------------------------------------
# Public wrapper
# ----------------------------------------------------------------------------
def spatial_attention(x, conv_weight, *, force_fallback=False):
    """x: (B, E, T).  conv_weight: (1, 2, K) (PyTorch OIH layout)."""
    B, E, T = x.shape
    itemsize = jnp.dtype(x.dtype).itemsize

    # Lane-dense time axis: zero-pad T up to a multiple of 128 so every store
    # is a full-width vst.  Zero columns have mean 0 / max 0, exactly what
    # Conv1d's own zero padding supplies, so the valid region is unaffected;
    # the pad is sliced off below.
    T_pad = ((T + LANE - 1) // LANE) * LANE
    pad_amt = T_pad - T
    x_p = jnp.pad(x, ((0, 0), (0, 0), (0, pad_amt))) if pad_amt else x

    # With >= PAD zero lanes on the right, the roll-based conv taps need no
    # per-lane mask; keep it only when T is within PAD of a multiple of 128.
    use_mask = pad_amt < PAD

    w_flat = conv_weight.reshape(-1).astype(jnp.float32)    # (2*K,) 1-D -> SMEM
    pass2_dtype = _pass2_dtype(x.dtype)
    block_budget, vmem_limit = _vmem_budgets()
    per_b_bytes = E * T_pad * itemsize

    if force_fallback or per_b_bytes > block_budget:
        out = _spatial_attention_fallback(
            w_flat, x_p, use_mask=use_mask, pass2_dtype=pass2_dtype,
            block_budget=block_budget, vmem_limit=vmem_limit)
        return out[:, :, :T] if pad_amt else out

    TB = _pick_batch_tile(B, E, T_pad, itemsize, block_budget)
    sub = _sublane_multiple(x.dtype)
    ec = _largest_aligned_divisor(
        E, sub, max(sub, CHUNK_VREG_BYTES // max(1, TB * T_pad * 4)))

    cost = pl.CostEstimate(
        flops=int(B * T_pad * (3 * E + 4 * KERNEL_SIZE + 1)),
        transcendentals=int(B * T_pad),
        bytes_accessed=int(2 * B * E * T_pad * itemsize + w_flat.size * 4),
    )

    out = pl.pallas_call(
        functools.partial(_spatial_attention_kernel, e_chunk=ec,
                          use_mask=use_mask, pass2_dtype=pass2_dtype),
        out_shape=jax.ShapeDtypeStruct((B, E, T_pad), x.dtype),
        grid_spec=pltpu.PrefetchScalarGridSpec(
            num_scalar_prefetch=0,
            grid=(B // TB,),
            in_specs=[
                pl.BlockSpec(memory_space=pltpu.MemorySpace.SMEM),    # weights
                # Default 2-deep buffering; pipeline_mode=pl.Buffered(3) only
                # if an xprof trace shows exposed input DMA.
                pl.BlockSpec((TB, E, T_pad), lambda b: (b, 0, 0)),    # x slab
            ],
            out_specs=pl.BlockSpec((TB, E, T_pad), lambda b: (b, 0, 0)),
        ),
        compiler_params=pltpu.CompilerParams(
            dimension_semantics=("parallel",),   # shards B across v7x's 2 TCs
            vmem_limit_bytes=vmem_limit,
        ),
        cost_estimate=cost,
        # input_output_aliases={1: 0} would let callers donate x's buffer;
        # omitted because the demo reuses x afterwards.
    )(w_flat, x_p)

    return out[:, :, :T] if pad_amt else out


def spatial_attention_reference(x, conv_weight):
    """Pure-JAX reference mirroring the PyTorch forward."""
    avg = jnp.mean(x, axis=1, keepdims=True)
    mx = jnp.max(x, axis=1, keepdims=True)
    y = jnp.concatenate([avg, mx], axis=1)                   # (B, 2, T)
    out = jax.lax.conv_general_dilated(
        y, conv_weight, window_strides=(1,), padding=[(PAD, PAD)],
        dimension_numbers=("NCH", "OIH", "NCH"))             # (B, 1, T)
    return x * jax.nn.sigmoid(out)


if __name__ == "__main__":
    root = jax.random.PRNGKey(0)
    kw, kx = jax.random.split(root)

    # Conv1d(2, 1, 7, bias=False) weight, PyTorch-style uniform init.
    bound = 1.0 / jnp.sqrt(2.0 * KERNEL_SIZE)
    conv_weight = jax.random.uniform(
        kw, (1, 2, KERNEL_SIZE), minval=-bound, maxval=bound, dtype=jnp.float32)

    cases = [
        # name,            shape,          dtype,        force_fallback, tol
        ("primary_small",  (2, 24, 16),    jnp.float32,  False, 1e-5),  # unmasked, grid=2
        ("primary_tb2",    (4, 80, 200),   jnp.float32,  False, 1e-5),  # TB=2, 2 E-chunks
        ("primary_masked", (2, 16, 128),   jnp.float32,  False, 1e-5),  # T%128==0 -> masked taps
        ("primary_bf16",   (2, 32, 16),    jnp.bfloat16, False, 2e-2),  # packed sublanes, bf16 pass 2
        ("fallback",       (2, 24, 16),    jnp.float32,  True,  1e-5),  # grid-tiled E reduction
    ]

    for i, (name, shape, dtype, force_fb, tol) in enumerate(cases):
        x = jax.random.normal(jax.random.fold_in(kx, i), shape, dtype=dtype)
        out = jax.block_until_ready(
            spatial_attention(x, conv_weight, force_fallback=force_fb))
        ref = spatial_attention_reference(x.astype(jnp.float32), conv_weight)
        assert out.shape == x.shape and out.dtype == x.dtype, name
        ok = jnp.allclose(out.astype(jnp.float32), ref, atol=tol, rtol=tol)
        assert bool(ok), f"{name}: kernel output does not match reference"

    print("KERNEL_OK")
</pallas_src>

<mosaic_0001>
module attributes {stable_mosaic.version = 11 : i64} {
  func.func @_spatial_attention_kernel(%arg0: i32, %arg1: memref<14xf32, #tpu.memory_space<smem>>, %arg2: memref<1x24x128xf32, #tpu.memory_space<vmem>>, %arg3: memref<1x24x128xf32, #tpu.memory_space<vmem>>) attributes {dimension_semantics = [#tpu.dimension_semantics<parallel>], iteration_bounds = array<i64: 2>, scalar_prefetch = 0 : i64, scratch_operands = 0 : i64, tpu.core_type = #tpu.core_type<tc>, window_params = [{transform_indices = @transform_0, window_bounds = array<i64: 14>}, {transform_indices = @transform_1, window_bounds = array<i64: 1, 24, 128>}, {transform_indices = @transform_2, window_bounds = array<i64: 1, 24, 128>}]} {
    %cst = arith.constant 0.000000e+00 : f32
    %0 = vector.broadcast %cst : f32 to vector<1x128xf32>
    %cst_0 = arith.constant 0xFF800000 : f32
    %1 = vector.broadcast %cst_0 : f32 to vector<1x128xf32>
    %c0 = arith.constant 0 : index
    %c0_1 = arith.constant 0 : index
    %c0_2 = arith.constant 0 : index
    %2 = vector.load %arg2[%c0, %c0_1, %c0_2] : memref<1x24x128xf32, #tpu.memory_space<vmem>>, vector<1x24x128xf32>
    %cst_3 = arith.constant dense<0.000000e+00> : vector<1x128xf32>
    %3 = vector.multi_reduction <add>, %2, %cst_3 [1] : vector<1x24x128xf32> to vector<1x128xf32>
    %4 = arith.addf %0, %3 : vector<1x128xf32>
    %cst_4 = arith.constant dense<0xFF800000> : vector<1x128xf32>
    %5 = vector.multi_reduction <maximumf>, %2, %cst_4 [1] : vector<1x24x128xf32> to vector<1x128xf32>
    %6 = arith.maximumf %1, %5 : vector<1x128xf32>
    %cst_5 = arith.constant 0.0416666679 : f32
    %7 = vector.broadcast %cst_5 : f32 to vector<1x128xf32>
    %8 = arith.mulf %4, %7 : vector<1x128xf32>
    %c0_6 = arith.constant 0 : index
    %9 = memref.load %arg1[%c0_6] : memref<14xf32, #tpu.memory_space<smem>>
    %c1 = arith.constant 1 : index
    %10 = memref.load %arg1[%c1] : memref<14xf32, #tpu.memory_space<smem>>
    %c2 = arith.constant 2 : index
    %11 = memref.load %arg1[%c2] : memref<14xf32, #tpu.memory_space<smem>>
    %c3 = arith.constant 3 : index
    %12 = memref.load %arg1[%c3] : memref<14xf32, #tpu.memory_space<smem>>
    %c4 = arith.constant 4 : index
    %13 = memref.load %arg1[%c4] : memref<14xf32, #tpu.memory_space<smem>>
    %c5 = arith.constant 5 : index
    %14 = memref.load %arg1[%c5] : memref<14xf32, #tpu.memory_space<smem>>
    %c6 = arith.constant 6 : index
    %15 = memref.load %arg1[%c6] : memref<14xf32, #tpu.memory_space<smem>>
    %c7 = arith.constant 7 : index
    %16 = memref.load %arg1[%c7] : memref<14xf32, #tpu.memory_space<smem>>
    %c8 = arith.constant 8 : index
    %17 = memref.load %arg1[%c8] : memref<14xf32, #tpu.memory_space<smem>>
    %c9 = arith.constant 9 : index
    %18 = memref.load %arg1[%c9] : memref<14xf32, #tpu.memory_space<smem>>
    %c10 = arith.constant 10 : index
    %19 = memref.load %arg1[%c10] : memref<14xf32, #tpu.memory_space<smem>>
    %c11 = arith.constant 11 : index
    %20 = memref.load %arg1[%c11] : memref<14xf32, #tpu.memory_space<smem>>
    %c12 = arith.constant 12 : index
    %21 = memref.load %arg1[%c12] : memref<14xf32, #tpu.memory_space<smem>>
    %c13 = arith.constant 13 : index
    %22 = memref.load %arg1[%c13] : memref<14xf32, #tpu.memory_space<smem>>
    %cst_7 = arith.constant 0.000000e+00 : f32
    %23 = vector.broadcast %cst_7 : f32 to vector<1x128xf32>
    %c3_i32 = arith.constant 3 : i32
    %24 = tpu.dynamic_rotate %8 by %c3_i32 dim 1 : vector<1x128xf32>, i32 -> vector<1x128xf32>
    %c3_i32_8 = arith.constant 3 : i32
    %25 = tpu.dynamic_rotate %6 by %c3_i32_8 dim 1 : vector<1x128xf32>, i32 -> vector<1x128xf32>
    %26 = vector.broadcast %9 : f32 to vector<1x128xf32>
    %27 = arith.mulf %26, %24 : vector<1x128xf32>
    %28 = arith.addf %23, %27 : vector<1x128xf32>
    %29 = vector.broadcast %16 : f32 to vector<1x128xf32>
    %30 = arith.mulf %29, %25 : vector<1x128xf32>
    %31 = arith.addf %28, %30 : vector<1x128xf32>
    %c2_i32 = arith.constant 2 : i32
    %32 = tpu.dynamic_rotate %8 by %c2_i32 dim 1 : vector<1x128xf32>, i32 -> vector<1x128xf32>
    %c2_i32_9 = arith.constant 2 : i32
    %33 = tpu.dynamic_rotate %6 by %c2_i32_9 dim 1 : vector<1x128xf32>, i32 -> vector<1x128xf32>
    %34 = vector.broadcast %10 : f32 to vector<1x128xf32>
    %35 = arith.mulf %34, %32 : vector<1x128xf32>
    %36 = arith.addf %31, %35 : vector<1x128xf32>
    %37 = vector.broadcast %17 : f32 to vector<1x128xf32>
    %38 = arith.mulf %37, %33 : vector<1x128xf32>
    %39 = arith.addf %36, %38 : vector<1x128xf32>
    %c1_i32 = arith.constant 1 : i32
    %40 = tpu.dynamic_rotate %8 by %c1_i32 dim 1 : vector<1x128xf32>, i32 -> vector<1x128xf32>
    %c1_i32_10 = arith.constant 1 : i32
    %41 = tpu.dynamic_rotate %6 by %c1_i32_10 dim 1 : vector<1x128xf32>, i32 -> vector<1x128xf32>
    %42 = vector.broadcast %11 : f32 to vector<1x128xf32>
    %43 = arith.mulf %42, %40 : vector<1x128xf32>
    %44 = arith.addf %39, %43 : vector<1x128xf32>
    %45 = vector.broadcast %18 : f32 to vector<1x128xf32>
    %46 = arith.mulf %45, %41 : vector<1x128xf32>
    %47 = arith.addf %44, %46 : vector<1x128xf32>
    %48 = vector.broadcast %12 : f32 to vector<1x128xf32>
    %49 = arith.mulf %48, %8 : vector<1x128xf32>
    %50 = arith.addf %47, %49 : vector<1x128xf32>
    %51 = vector.broadcast %19 : f32 to vector<1x128xf32>
    %52 = arith.mulf %51, %6 : vector<1x128xf32>
    %53 = arith.addf %50, %52 : vector<1x128xf32>
    %c127_i32 = arith.constant 127 : i32
    %54 = tpu.dynamic_rotate %8 by %c127_i32 dim 1 : vector<1x128xf32>, i32 -> vector<1x128xf32>
    %c127_i32_11 = arith.constant 127 : i32
    %55 = tpu.dynamic_rotate %6 by %c127_i32_11 dim 1 : vector<1x128xf32>, i32 -> vector<1x128xf32>
    %56 = vector.broadcast %13 : f32 to vector<1x128xf32>
    %57 = arith.mulf %56, %54 : vector<1x128xf32>
    %58 = arith.addf %53, %57 : vector<1x128xf32>
    %59 = vector.broadcast %20 : f32 to vector<1x128xf32>
    %60 = arith.mulf %59, %55 : vector<1x128xf32>
    %61 = arith.addf %58, %60 : vector<1x128xf32>
    %c126_i32 = arith.constant 126 : i32
    %62 = tpu.dynamic_rotate %8 by %c126_i32 dim 1 : vector<1x128xf32>, i32 -> vector<1x128xf32>
    %c126_i32_12 = arith.constant 126 : i32
    %63 = tpu.dynamic_rotate %6 by %c126_i32_12 dim 1 : vector<1x128xf32>, i32 -> vector<1x128xf32>
    %64 = vector.broadcast %14 : f32 to vector<1x128xf32>
    %65 = arith.mulf %64, %62 : vector<1x128xf32>
    %66 = arith.addf %61, %65 : vector<1x128xf32>
    %67 = vector.broadcast %21 : f32 to vector<1x128xf32>
    %68 = arith.mulf %67, %63 : vector<1x128xf32>
    %69 = arith.addf %66, %68 : vector<1x128xf32>
    %c125_i32 = arith.constant 125 : i32
    %70 = tpu.dynamic_rotate %8 by %c125_i32 dim 1 : vector<1x128xf32>, i32 -> vector<1x128xf32>
    %c125_i32_13 = arith.constant 125 : i32
    %71 = tpu.dynamic_rotate %6 by %c125_i32_13 dim 1 : vector<1x128xf32>, i32 -> vector<1x128xf32>
    %72 = vector.broadcast %15 : f32 to vector<1x128xf32>
    %73 = arith.mulf %72, %70 : vector<1x128xf32>
    %74 = arith.addf %69, %73 : vector<1x128xf32>
    %75 = vector.broadcast %22 : f32 to vector<1x128xf32>
    %76 = arith.mulf %75, %71 : vector<1x128xf32>
    %77 = arith.addf %74, %76 : vector<1x128xf32>
    %78 = arith.negf %77 : vector<1x128xf32>
    %79 = math.exp %78 : vector<1x128xf32>
    %cst_14 = arith.constant 1.000000e+00 : f32
    %80 = vector.broadcast %cst_14 : f32 to vector<1x128xf32>
    %81 = arith.addf %80, %79 : vector<1x128xf32>
    %82 = arith.divf %80, %81 : vector<1x128xf32>
    %83 = vector.shape_cast %82 : vector<1x128xf32> to vector<1x1x128xf32>
    %84 = vector.shape_cast %83 : vector<1x1x128xf32> to vector<1x1x128xf32>
    %85 = vector.broadcast %84 : vector<1x1x128xf32> to vector<1x24x128xf32>
    %c0_15 = arith.constant 0 : index
    %c0_16 = arith.constant 0 : index
    %c0_17 = arith.constant 0 : index
    %86 = vector.load %arg2[%c0_15, %c0_16, %c0_17] : memref<1x24x128xf32, #tpu.memory_space<vmem>>, vector<1x24x128xf32>
    %87 = arith.mulf %86, %85 : vector<1x24x128xf32>
    %c0_18 = arith.constant 0 : index
    %c0_19 = arith.constant 0 : index
    %c0_20 = arith.constant 0 : index
    %88 = vector.load %arg3[%c0_18, %c0_19, %c0_20] : memref<1x24x128xf32, #tpu.memory_space<vmem>>, vector<1x24x128xf32>
    tpu.vector_store %arg3[%c0_18, %c0_19, %c0_20], %87 {strides = array<i32>} : memref<1x24x128xf32, #tpu.memory_space<vmem>>, vector<1x24x128xf32>,
    return
  }
  func.func @transform_0(%arg0: i32) -> i32 {
    %c0_i32 = arith.constant 0 : i32
    %c0_i32_0 = arith.constant 0 : i32
    return %c0_i32 : i32
  }
  func.func @transform_1(%arg0: i32) -> (i32, i32, i32) {
    %c0_i32 = arith.constant 0 : i32
    %c0_i32_0 = arith.constant 0 : i32
    %c0_i32_1 = arith.constant 0 : i32
    return %arg0, %c0_i32, %c0_i32_0 : i32, i32, i32
  }
  func.func @transform_2(%arg0: i32) -> (i32, i32, i32) {
    %c0_i32 = arith.constant 0 : i32
    %c0_i32_0 = arith.constant 0 : i32
    %c0_i32_1 = arith.constant 0 : i32
    return %arg0, %c0_i32, %c0_i32_0 : i32, i32, i32
  }
}

</mosaic_0001>

<bundles_post_ra>
// kernel: tpu_custom_call.1
= control target key start
LH: loop header
LB: loop body
LE: loop exit
PB: predicated region body
PF: predicated region fallthrough
CT: control target
= control target key end

     0   :  { %7 = vsyncpa [#allocation5], 0  ;;  %s818_s0 = inlined_call_operand.hbm [shape: f32[14], index: 0, kind: input, shape index: {}]   ;;  %s819_s1 = inlined_call_operand.hbm [shape: f32[2,24,128], index: 1, kind: input, shape index: {}]   ;;  %s820_s2 = inlined_call_operand.hbm [shape: f32[2,24,128], index: 2, kind: output, shape index: {}]  }
   0x1   :  { %8 = vsyncpa [#allocation3], 0 }
   0x2   :  { %10 = vsyncpa [#allocation3 + $0x1], 0 }
   0x3   :  { %11 = vsyncpa [#allocation4], 0 }
   0x4   :  { %13 = vsyncpa [#allocation4 + $0x1], 0  ;;  %s626_s9 = smov 0   ;;  %s628_s10 = smov 0  }
   0x5   :  { %s630_s11 = smov 0   ;;  %s632_s12 = smov 0  }
   0x6 LB: > { %s647_s13 = sadd.s32 4294967295, %s596_s12   ;;  %s390_s14 = sadd.s32 4294967294, %s596_s12   ;;  %s596_s12 = sphi %s632_s12, %s842_s12   ;;  %s592_s11 = sphi %s630_s11, %s841_s11   ;;  %s588_s10 = sphi %s628_s10, %s840_s10   ;;  %s584_s9 = sphi %s626_s9, %s839_s9  }
   0x7   : > { %s651_s15 = sadd.s32 1, %s596_s12   ;;  %s47_s16 = sadd.s32 1, %s592_s11 }
   0x8   : > { %s44_s17 = ssub.s32 %s596_s12, %s651_s15  ;;  %p54_p0 = scmp.ne.s32.totalorder %s592_s11, %s588_s10 }
   0x9   : > { %p45_p1 = scmp.eq.s32.totalorder %s44_s17, 0  ;;  %p55_p2 = scmp.eq.s32.totalorder %s596_s12, 0 }
   0xa   : > { %p60_p3 = scmp.ne.s32.totalorder %s588_s10, %s584_s9  ;;  %p821_p4 = scmp.eq.s32.totalorder %s647_s13, 0 }
   0xb   : > { %s663_s18 = scalar_select %p45_p1, %s592_s11, %s47_s16  }
   0xc   : > { %p665_p5 = por %p55_p2, %p54_p0  ;;  %p671_p6 = por %p821_p4, %p60_p3 }
   0xd   : > { %p84_p7 = scmp.eq.s32.totalorder %s647_s13, 1  ;;  %p90_p8 = scmp.eq.s32.totalorder %s390_s14, 1 }
   0xe   : > { %s826_s20 = scalar_select %p671_p6, 1, 0 }
   0xf   : > { %p391_p9 = scmp.ge.s32.totalorder %s596_s12, 1  ;;  %p97_p10 = scmp.lt.s32.totalorder %s596_s12, 3 }
  0x10   : > { %p678_p11 = por %p84_p7, %p54_p0  ;;  %p682_p12 = por %p90_p8, %p60_p3 }
  0x11   : > { %p686_p13 = pnand %p391_p9, %p97_p10  ;;  %p439_p4 = scmp.lt.s32.totalorder %s596_s12, 2 }
  0x12   : > { %s827_s21 = scalar_select %p678_p11, 1, 0 }
  0x13   : > { %s828_s22 = scalar_select %p682_p12, 1, 0 }
  0x14   : > { %s829_s23 = scalar_select %p686_p13, 1, 0 }
  0x15   : > { %p426_p2 = pneg %p686_p13  ;;  %s119_s24 = sand.u32 1, %s592_s11  }
  0x16   : > { %s415_s25 = smul.u32 384, %s596_s12  ;;  %p830_p6 = scmp.eq.s32.totalorder %s647_s13, 0 }
  0x17   : > { %p700_p7 = pnand %p439_p4, %p665_p5  ;;  %s414_s27 = smul.u32 24, %s119_s24 }
  0x18   : > { %p427_p0 = pnand %p426_p2, %p830_p6  ;;  %s598_s28 = smov [#allocation2]  }
  0x19   : > { %s710_s5 = scalar_lea.hbm %s819_s1, %s415_s25  ;;  %s123_s6 = scalar_lea.vmem [#allocation6], %s414_s27 }
  0x1a   : > { %429 = dma.hbm_to_smem (!%p427_p0), %s818_s0, 16, %s598_s28, [#allocation5]  }
  0x1b   : > { %s130_s7 = sshll.u32 %s123_s6, 4  ;;  %s714_s8 = scalar_lea.sflag [#allocation3], %s119_s24  ;;  %s712_s7 = int_to_ptr.vmem [resolvable:$true] %s130_s7 }
  0x1c   : > { %s500_s14 = scalar_lea.hbm %s710_s5, 384  ;;  %p502_p4 = pneg %p700_p7 }
  0x1d   : > { %p501_p3 = scmp.ne.s32.totalorder %s710_s5, %s500_s14  ;;  %s505_s19 = scalar_lea.hbm %s819_s1, 768 }
  0x1e   : > { %p506_p8 = scmp.lt.s32.totalorder %s710_s5, %s819_s1  ;;  %p507_p9 = scmp.lt.s32.totalorder %s505_s19, %s500_s14 }
  0x1f   : > { %p503_p5 = pnand %p502_p4, %p501_p3 }
  0x20   : > { %p508_p10 = por %p507_p9, %p506_p8 }
  0x21   : > { %p504_p6 = pneg %p503_p5 }
  0x23   : > { %p509_p2 = pnand %p508_p10, %p504_p6 }
  0x25   : > { %512 = shalt.err (!%p509_p2)
}
  0x26   : > { %s513_s24 = scalar_lea.vmem %s712_s7, 384  ;;  %s599_s27 = smov [#allocation6]  }
  0x27   : > { %p514_p0 = scmp.ne.s32.totalorder %s712_s7, %s513_s24  ;;  %s518_s29 = sshll.u32 %s599_s27, 4  ;;  %s519_s29 = int_to_ptr.vmem [resolvable:$false] %s518_s29 }
  0x28   : > { %s520_s30 = scalar_lea.vmem %s519_s29, 768  ;;  %p521_p5 = scmp.lt.s32.totalorder %s712_s7, %s519_s29 }
  0x29   : > { %p516_p1 = pnand %p514_p0, %p502_p4  ;;  %p522_p12 = scmp.lt.s32.totalorder %s520_s30, %s513_s24 }
  0x2b   : > { %p517_p3 = pneg %p516_p1  ;;  %p523_p11 = por %p522_p12, %p521_p5 }
  0x2d   : > { %p524_p13 = pnand %p523_p11, %p517_p3 }
  0x2f   : > { %527 = shalt.err (!%p524_p13)
}
  0x30   : > { %s600_s3 = smov 128   ;;  %s601_s4 = smov 8  }
  0x31   : > { %433 = dma.hbm_to_vmem [thread:$0]  (!%p700_p7), %s710_s5, 384, %s712_s7, %s714_s8, %s600_s3, %s600_s3, %s601_s4  }
  0x32   : > { %p832_p4 = scmp.ne.s32.totalorder %s829_s23, 0 }
  0x33   : > { %p833_p1 = scmp.eq.s32.totalorder (!%p832_p4), %s647_s13, 0 }
  0x34   : > { %142 = sbr.rel (%p832_p4) target bundleno = 282 (0x11a), region = 28 }
  0x39   : > { %571 = dma.done.wait (%p833_p1), [#allocation5], 16   ;;  %p834_p6 = pmov %p833_p1 }
  0x3a   : > { %s742_s6 = sand.u32 1, %s588_s10   ;;  %p835_p11 = scmp.ne.s32.totalorder %s826_s20, 0 }
  0x3b   : > { %573 = vsyncadd (%p834_p6), [#allocation5], 4294967280  ;;  %s416_s14 = smul.u32 24, %s742_s6  ;;  %s149_s16 = scalar_lea.sflag [#allocation3], %s742_s6 }
  0x3d   : > { %s152_s26 = scalar_lea.vmem [#allocation6], %s416_s14 }
  0x3e   : > { %575 = dma.done.wait (%p835_p11), %s149_s16, 384  }
  0x3f   : > { %577 = vsyncadd (%p835_p11), %s149_s16, 4294966912 }
  0x40   : > { %157 = sfence }
  0x41   : > { %v752_v0 = vld [vmem:[%s152_s26] sm:$0xff]  ;;  %v754_v1 = vld [vmem:[%s152_s26 + $0x8] sm:$0xff]  ;;  %v756_v2 = vld [vmem:[%s152_s26 + $0x10] sm:$0xff]  ;;  %s602_s20 = smov 3   ;;  %s603_s23 = smov 2  }
  0x42   : > { %v177_v3 = vadd.f32 %v754_v1, %v752_v0  ;;  %v186_v4 = vmax.f32 %v752_v0, %v754_v1  ;;  %s604_s5 = smov 1   ;;  %s605_s7 = smov 127  }
  0x43   : > { %s606_s8 = smov 126   ;;  %s607_s17 = smov 125  }
  0x44   : > { %v178_v5 = vadd.f32 %v177_v3, %v756_v2  ;;  %v187_v6 = vmax.f32 %v186_v4, %v756_v2  ;;  %s195_s19 = sld [smem:[#allocation2]]  ;;  %p836_p13 = scmp.ne.s32.totalorder %s827_s21, 0 }
  0x45   : > { %s403_s25 = sld [smem:[#allocation2 + $0x7]] }
  0x46   : > { %v179_v7 = vrot.slane %v178_v5, 4  ;;  %v188_v8 = vrot.slane %v187_v6, 4  ;;  %s397_s28 = sld [smem:[#allocation2 + $0x1]] }
  0x47   : > { %s404_s24 = sld [smem:[#allocation2 + $0x8]] }
  0x48   : > { %v180_v9 = vadd.f32 %v179_v7, %v178_v5  ;;  %v189_v10 = vmax.f32 %v187_v6, %v188_v8  ;;  %s398_s27 = sld [smem:[#allocation2 + $0x2]] }
  0x49   : > { %s405_s29 = sld [smem:[#allocation2 + $0x9]] }
  0x4a   : > { %v181_v11 = vrot.slane %v180_v9, 2  ;;  %v190_v12 = vrot.slane %v189_v10, 2  ;;  %v213_v22 = vstv %s195_s19  ;;  %s399_s30 = sld [smem:[#allocation2 + $0x3]] }
  0x4b   : > { %v216_v23 = vstv %s403_s25  ;;  %s406_s3 = sld [smem:[#allocation2 + $0xa]] }
  0x4c   : > { %v182_v13 = vadd.f32 %v181_v11, %v180_v9  ;;  %v191_v14 = vmax.f32 %v189_v10, %v190_v12  ;;  %v223_v24 = vstv %s397_s28  ;;  %s400_s4 = sld [smem:[#allocation2 + $0x4]] }
  0x4d   : > { %v226_v26 = vstv %s404_s24  ;;  %s407_s16 = sld [smem:[#allocation2 + $0xb]]  ;;  %s608_s24 = smov [#allocation7]  }
  0x4e   : > { %v183_v15 = vrot.slane %v182_v13, 1  ;;  %v192_v17 = vrot.slane %v191_v14, 1  ;;  %v233_v30 = vstv %s398_s27  ;;  %s401_s26 = sld [smem:[#allocation2 + $0x5]]  ;;  %s532_s27 = sshll.u32 %s608_s24, 4  ;;  %s533_s27 = int_to_ptr.vmem [resolvable:$false] %s532_s27 }
  0x4f   : > { %v236_v35 = vstv %s405_s29  ;;  %s534_s29 = scalar_lea.vmem %s533_s27, 768 }
  0x50   : > { %v184_v16 = vadd.f32 %v183_v15, %v182_v13  ;;  %v193_v19 = vmax.f32 %v191_v14, %v192_v17  ;;  %v239_v39 = vstv %s399_s30  ;;  %v281_v15 = vlaneseq }
  0x51   : > { %v242_v42 = vstv %s406_s3 }
  0x52   : > { %v194_v18 = vmul.f32 0.041666668, %v184_v16  ;;  %v249_v47 = vstv %s400_s4  ;;  %v243_v49 = vmul.f32 %v242_v42, %v193_v19  ;;  %v282_v16 = vshrl.u32 %v281_v15, 7 }
  0x53   : > { %v252_v50 = vstv %s407_s16 }
  0x54   : > { %209 = vrot.lane.b32.xlu0 %v194_v18, %s602_s20  ;;  %219 = vrot.lane.b32.xlu1 %v194_v18, %s603_s23  ;;  %v240_v46 = vmul.f32 %v239_v39, %v194_v18  ;;  %v259_v54 = vstv %s401_s26  ;;  %v283_v17 = vsub.s32 0, %v282_v16 }
  0x58   : > { %211 = vrot.lane.b32.xlu0 %v193_v19, %s602_s20  ;;  %221 = vrot.lane.b32.xlu1 %v193_v19, %s603_s23  ;;  %s408_s20 = sld [smem:[#allocation2 + $0xc]] }
  0x59   : > { %s402_s23 = sld [smem:[#allocation2 + $0x6]] }
  0x5c   : > { %229 = vrot.lane.b32.xlu0 %v194_v18, %s604_s5  ;;  %231 = vrot.lane.b32.xlu1 %v193_v19, %s604_s5  ;;  %s409_s5 = sld [smem:[#allocation2 + $0xd]] }
  0x5e   : > { %v262_v58 = vstv %s408_s20 }
  0x5f   : > { %v269_v61 = vstv %s402_s23 }
  0x60   : > { %245 = vrot.lane.b32.xlu0 %v194_v18, %s605_s7  ;;  %247 = vrot.lane.b32.xlu1 %v193_v19, %s605_s7  ;;  %s417_s7 = smul.u32 384, %s647_s13  ;;  %s292_s13 = scalar_lea.sflag [#allocation4], %s742_s6 }
  0x62   : > { %v272_v4 = vstv %s409_s5  ;;  %s770_s28 = scalar_lea.hbm %s820_s2, %s417_s7 }
  0x64   : > { %255 = vrot.lane.b32.xlu0 %v194_v18, %s606_s8  ;;  %257 = vrot.lane.b32.xlu1 %v193_v19, %s606_s8  ;;  %s173_s8 = scalar_lea.vmem [#allocation7], %s416_s14 }
  0x68   : > { %265 = vrot.lane.b32.xlu0 %v194_v18, %s607_s17  ;;  %267 = vrot.lane.b32.xlu1 %v193_v19, %s607_s17  ;;  %s305_s17 = sshll.u32 %s173_s8, 4  ;;  %s772_s17 = int_to_ptr.vmem [resolvable:$true] %s305_s17 }
  0x69   : > { %s528_s14 = scalar_lea.vmem %s772_s17, 384  ;;  %p535_p9 = scmp.lt.s32.totalorder %s772_s17, %s533_s27 }
  0x6a   : > { %p529_p12 = scmp.ne.s32.totalorder %s772_s17, %s528_s14  ;;  %p536_p10 = scmp.lt.s32.totalorder %s534_s29, %s528_s14 }
  0x6c   : > { %p530_p7 = pnand %p529_p12, %p836_p13  ;;  %p537_p2 = por %p536_p10, %p535_p9 }
  0x6e   : > { %p531_p8 = pneg %p530_p7 }
  0x70   : > { %p538_p0 = pnand %p537_p2, %p531_p8 }
  0xc6   : > { %v210_v20 = vpop.permute.xlu0 %209  ;;  %v220_v21 = vpop.permute.xlu1 %219 }
  0xc7   : > { %v214_v28 = vmul.f32 %v213_v22, %v210_v20  ;;  %v224_v31 = vmul.f32 %v223_v24, %v220_v21 }
  0xca   : > { %v212_v25 = vpop.permute.xlu0 %211  ;;  %v222_v27 = vpop.permute.xlu1 %221 }
  0xcb   : > { %v217_v29 = vmul.f32 %v216_v23, %v212_v25  ;;  %v227_v33 = vmul.f32 %v226_v26, %v222_v27 }
  0xcd   : > { %v218_v32 = vadd.f32 %v217_v29, %v214_v28 }
  0xce   : > { %v230_v34 = vpop.permute.xlu0 %229  ;;  %v232_v36 = vpop.permute.xlu1 %231 }
  0xcf   : > { %v225_v37 = vadd.f32 %v224_v31, %v218_v32  ;;  %v234_v38 = vmul.f32 %v233_v30, %v230_v34  ;;  %v237_v41 = vmul.f32 %v236_v35, %v232_v36 }
  0xd1   : > { %v228_v40 = vadd.f32 %v227_v33, %v225_v37 }
  0xd2   : > { %v246_v43 = vpop.permute.xlu0 %245  ;;  %v248_v44 = vpop.permute.xlu1 %247 }
  0xd3   : > { %v235_v45 = vadd.f32 %v234_v38, %v228_v40  ;;  %v250_v53 = vmul.f32 %v249_v47, %v246_v43  ;;  %v253_v57 = vmul.f32 %v252_v50, %v248_v44 }
  0xd5   : > { %v238_v48 = vadd.f32 %v237_v41, %v235_v45 }
  0xd6   : > { %v256_v51 = vpop.permute.xlu0 %255  ;;  %v258_v55 = vpop.permute.xlu1 %257 }
  0xd7   : > { %v241_v52 = vadd.f32 %v240_v46, %v238_v48  ;;  %v260_v60 = vmul.f32 %v259_v54, %v256_v51  ;;  %v263_v3 = vmul.f32 %v262_v58, %v258_v55 }
  0xd9   : > { %v244_v56 = vadd.f32 %v243_v49, %v241_v52 }
  0xda   : > { %v266_v62 = vpop.permute.xlu0 %265  ;;  %v268_v5 = vpop.permute.xlu1 %267 }
  0xdb   : > { %v251_v59 = vadd.f32 %v250_v53, %v244_v56  ;;  %v270_v7 = vmul.f32 %v269_v61, %v266_v62  ;;  %v273_v9 = vmul.f32 %v272_v4, %v268_v5 }
  0xdd   : > { %v254_v63 = vadd.f32 %v253_v57, %v251_v59 }
  0xdf   : > { %v261_v6 = vadd.f32 %v260_v60, %v254_v63 }
  0xe1   : > { %v264_v8 = vadd.f32 %v263_v3, %v261_v6 }
  0xe3   : > { %v271_v10 = vadd.f32 %v270_v7, %v264_v8 }
  0xe5   : > { %v274_v11 = vadd.f32 %v273_v9, %v271_v10 }
  0xe7   : > { %v410_v12 = vmul.f32 -1.442695, %v274_v11 }
  0xe9   : > { %485 = vpow2.f32 %v410_v12 }
  0xf6   : > { %v486_v13 = vpop.eup %485 }
  0xf7   : > { %v278_v14 = vadd.f32 1.0, %v486_v13 }
  0xf9   : > { %487 = vrcp.f32 %v278_v14 }
 0x106   : > { %v488_v18 = vpop.eup %487 }
 0x107   : > { %v284_v19 = vrot.slane %v488_v18, %v283_v17 }
 0x109   : > { %v285_v20 = vmul.f32 %v284_v19, %v752_v0  ;;  %v286_v21 = vmul.f32 %v284_v19, %v754_v1  ;;  %v287_v22 = vmul.f32 %v284_v19, %v756_v2 }
 0x10b   : > { %288 = vst [vmem:[%s173_s8] sm:$0xff] %v285_v20  ;;  %289 = vst [vmem:[%s173_s8 + $0x8] sm:$0xff] %v286_v21 }
 0x10c   : > { %290 = vst [vmem:[%s173_s8 + $0x10] sm:$0xff] %v287_v22 }
 0x10d   : > { %541 = shalt.err (!%p538_p0)
}
 0x10e   : > { %s542_s30 = scalar_lea.hbm %s770_s28, 384  ;;  %s546_s16 = scalar_lea.hbm %s820_s2, 768 }
 0x10f   : > { %p543_p3 = scmp.ne.s32.totalorder %s770_s28, %s542_s30  ;;  %p547_p1 = scmp.lt.s32.totalorder %s770_s28, %s820_s2 }
 0x110   : > { %p548_p6 = scmp.lt.s32.totalorder %s546_s16, %s542_s30 }
 0x111   : > { %p544_p5 = pnand %p543_p3, %p836_p13 }
 0x112   : > { %p549_p11 = por %p548_p6, %p547_p1 }
 0x113   : > { %p545_p4 = pneg %p544_p5 }
 0x115   : > { %p550_p12 = pnand %p549_p11, %p545_p4 }
 0x117   : > { %553 = shalt.err (!%p550_p12)
}
 0x118   : > { %s609_s23 = smov 128   ;;  %s610_s5 = smov 8  }
 0x119   : > { %424 = dma.vmem_to_hbm [thread:$0]  (%p836_p13), %s772_s17, 384, %s770_s28, %s292_s13, %s609_s23, %s609_s23, %s610_s5  }
 0x11a PF: > { %s320_s7 = sand.u32 1, %s584_s9   ;;  %p837_p7 = scmp.ne.s32.totalorder %s828_s22, 0 }
 0x11b   : > { %p838_p8 = scmp.ge.s32.totalorder %s596_s12, 2  ;;  %s321_s8 = scalar_lea.sflag [#allocation4], %s320_s7 }
 0x11d   : > { %p435_p9 = pnand %p838_p8, %p837_p7 }
 0x11f   : > { %p436_p10 = pneg %p435_p9 }
 0x121   : > { %579 = dma.done.wait (%p436_p10), %s321_s8, 384  }
 0x122   : > { %581 = vsyncadd (%p436_p10), %s321_s8, 4294966912  ;;  %p16_p2 = scmp.ge.s32.totalorder %s651_s15, 4   ;;  %s839_s9 = smov %s588_s10 }
 0x123   : > { %s840_s10 = smov %s592_s11  ;;  %s841_s11 = smov %s663_s18 }
 0x124   : > { %s842_s12 = smov %s651_s15  ;;  %18 = sbr.rel (!%p16_p2) target bundleno = 6 (0x6), region = 78 }
 0x129   :  { %326 = vsyncpa [#allocation3], 1 }
 0x12a   :  { %328 = vsyncpa [#allocation3 + $0x1], 1 }
 0x12b   :  { %329 = vsyncpa [#allocation4], 1 }
 0x12c   :  { %331 = vsyncpa [#allocation4 + $0x1], 1 }
 0x12d   :  { %332 = vsyncpa [#allocation5], 1 }
 0x12e   :  { %334 = vsyncpa [#allocation5 + $0x1], 1 }

</bundles_post_ra>
